<compile_context>
chip_gen: v5e
topology: v5e:2x2
jax: 0.10.0
libtpu: 0.0.40
codegen_flags: <defaults>
</compile_context>

<pallas_src>
import functools

import jax
import jax.numpy as jnp
from jax.experimental import pallas as pl
from jax.experimental.pallas import tpu as pltpu


def _stats_kernel(patches_ref, w1t_ref, psum_ref, psumsq_ref):
    # conv1 as one im2col matmul on the MXU: (Chid, K) @ (K, TR) -> (Chid, TR), f32 accum.
    acc = jnp.dot(w1t_ref[...], patches_ref[...], preferred_element_type=jnp.float32)
    # Per-channel partial sums for BN batch statistics (one-pass: sum and sum-of-squares).
    psum_ref[0, :, :] = jnp.sum(acc, axis=1, keepdims=True)
    psumsq_ref[0, :, :] = jnp.sum(acc * acc, axis=1, keepdims=True)


def _fused_kernel(patches_ref, w1t_ref, scale_ref, shift_ref, w2t_ref, b2_ref, out_ref):
    # conv1 (recomputed, same bf16 inputs as the stats pass -> bit-identical).
    acc = jnp.dot(w1t_ref[...], patches_ref[...], preferred_element_type=jnp.float32)
    # BN folded to per-channel scale/shift, then ReLU -- all in f32 on the VPU.
    y = jnp.maximum(acc * scale_ref[...] + shift_ref[...], 0.0)
    # 1x1 conv == matmul: (Cout, Chid) @ (Chid, TR) -> (Cout, TR), lane-dense store.
    out = jnp.dot(w2t_ref[...], y.astype(jnp.bfloat16), preferred_element_type=jnp.float32)
    out_ref[...] = out + b2_ref[...]


@functools.partial(jax.jit, static_argnames=("row_tile",))
def expert_forward(x_nchw, w1, gamma, beta, w2, b2, *, row_tile=256):
    """x_nchw: (N, Cin, H, W) f32 -> (N, Cout, H, W) f32 (matches PyTorch Expert.forward).

    w1: (3, 3, Cin, Chid) HWIO conv1 weight; gamma/beta: (Chid,) BN affine;
    w2: (Chid, Cout) 1x1 conv weight; b2: (Cout,) bias.
    row_tile: tile over the flattened N*H*W axis (multiple of 128; use >=512 at prod sizes).
    """
    N, Cin, H, W = x_nchw.shape
    Chid = w1.shape[-1]
    Cout = w2.shape[-1]
    eps = 1e-5

    assert row_tile % 128 == 0, "row_tile must be a multiple of 128 (lane width)"
    rows = N * H * W
    rows_pad = pl.cdiv(rows, row_tile) * row_tile
    num_tiles = rows_pad // row_tile

    K = 9 * Cin
    Kp = ((K + 7) // 8) * 8  # sublane-align the contraction dim

    # ---- im2col in the wrapper (XLA handles layout outside the kernel) ----
    x_nhwc = jnp.transpose(x_nchw, (0, 2, 3, 1))
    xpad = jnp.pad(x_nhwc, ((0, 0), (1, 1), (1, 1), (0, 0)))
    patches = jnp.stack(
        [xpad[:, dy:dy + H, dx:dx + W, :] for dy in range(3) for dx in range(3)],
        axis=3)                                   # (N, H, W, 9, Cin)
    patches = patches.reshape(rows, K)            # K index = (dy*3+dx)*Cin + c
    # Channel-major: (Kp, rows_pad). Zero-padded rows/cols contribute 0 to conv & BN sums.
    patches_t = jnp.pad(patches.T, ((0, Kp - K), (0, rows_pad - rows))).astype(jnp.bfloat16)

    w1_t = jnp.pad(w1.reshape(K, Chid), ((0, Kp - K), (0, 0))).T.astype(jnp.bfloat16)  # (Chid, Kp)
    w2_t = w2.T.astype(jnp.bfloat16)                                                   # (Cout, Chid)
    b2_t = b2.reshape(Cout, 1).astype(jnp.float32)

    cparams = pltpu.CompilerParams(
        dimension_semantics=("parallel",),         # disjoint output blocks per tile -> megacore OK
        vmem_limit_bytes=32 * 1024 * 1024)         # explicit; fits v5e/v6e/v7x scoped VMEM

    patches_spec = pl.BlockSpec((Kp, row_tile), lambda i: (0, i))
    w1_spec = pl.BlockSpec((Chid, Kp), lambda i: (0, 0))

    # ---- pass 1: conv1 + per-tile partial BN statistics ----
    psum, psumsq = pl.pallas_call(
        _stats_kernel,
        out_shape=(jax.ShapeDtypeStruct((num_tiles, Chid, 1), jnp.float32),
                   jax.ShapeDtypeStruct((num_tiles, Chid, 1), jnp.float32)),
        grid=(num_tiles,),
        in_specs=[patches_spec, w1_spec],
        out_specs=(pl.BlockSpec((1, Chid, 1), lambda i: (i, 0, 0)),
                   pl.BlockSpec((1, Chid, 1), lambda i: (i, 0, 0))),
        compiler_params=cparams,
    )(patches_t, w1_t)

    # ---- fold BN (batch stats, biased var) + affine into per-channel scale/shift (tiny) ----
    cnt = float(rows)
    mean = jnp.sum(psum[:, :, 0], axis=0) / cnt        # (Chid,)
    ex2 = jnp.sum(psumsq[:, :, 0], axis=0) / cnt
    var = ex2 - mean * mean                            # biased variance (PyTorch BN training fwd)
    inv = jax.lax.rsqrt(var + eps)
    scale = (gamma * inv).reshape(Chid, 1).astype(jnp.float32)
    shift = (beta - mean * gamma * inv).reshape(Chid, 1).astype(jnp.float32)

    # ---- pass 2: conv1 (recomputed) + BN + ReLU + 1x1 conv, lane-dense (Cout, rows) output ----
    out_t = pl.pallas_call(
        _fused_kernel,
        out_shape=jax.ShapeDtypeStruct((Cout, rows_pad), jnp.float32),
        grid=(num_tiles,),
        in_specs=[patches_spec, w1_spec,
                  pl.BlockSpec((Chid, 1), lambda i: (0, 0)),
                  pl.BlockSpec((Chid, 1), lambda i: (0, 0)),
                  pl.BlockSpec((Cout, Chid), lambda i: (0, 0)),
                  pl.BlockSpec((Cout, 1), lambda i: (0, 0))],
        out_specs=pl.BlockSpec((Cout, row_tile), lambda i: (0, i)),
        compiler_params=cparams,
    )(patches_t, w1_t, scale, shift, w2_t, b2_t)

    out = out_t[:, :rows].reshape(Cout, N, H, W)
    return jnp.transpose(out, (1, 0, 2, 3))


def expert_reference(x_nchw, w1, gamma, beta, w2, b2):
    """Pure-JAX f32 reference (NHWC) for correctness checking."""
    x = jnp.transpose(x_nchw, (0, 2, 3, 1))
    y = jax.lax.conv_general_dilated(
        x, w1, window_strides=(1, 1), padding="SAME",
        dimension_numbers=("NHWC", "HWIO", "NHWC"))
    mean = jnp.mean(y, axis=(0, 1, 2), keepdims=True)
    var = jnp.mean((y - mean) ** 2, axis=(0, 1, 2), keepdims=True)
    y = (y - mean) * jax.lax.rsqrt(var + 1e-5)
    y = y * gamma.reshape(1, 1, 1, -1) + beta.reshape(1, 1, 1, -1)
    y = jnp.maximum(y, 0.0)
    out = jnp.einsum("nhwc,cd->nhwd", y, w2) + b2.reshape(1, 1, 1, -1)
    return jnp.transpose(out, (0, 3, 1, 2))


if __name__ == "__main__":
    # Small shapes consistent with Expert(input_dim=4, output_dim=8, hidden_dim=32)
    N, Cin, H, W = 2, 4, 16, 16
    Chid, Cout = 32, 8

    key = jax.random.PRNGKey(0)
    kx, kw1, kw2, kb2 = jax.random.split(key, 4)

    x = jax.random.normal(kx, (N, Cin, H, W), jnp.float32)
    # Deterministic synthetic parameters (PyTorch BN defaults: gamma=1, beta=0)
    w1 = jax.random.normal(kw1, (3, 3, Cin, Chid), jnp.float32) * 0.1   # cnn1 weight (HWIO)
    gamma = jnp.ones((Chid,), jnp.float32)                               # bn1 weight
    beta = jnp.zeros((Chid,), jnp.float32)                               # bn1 bias
    w2 = jax.random.normal(kw2, (Chid, Cout), jnp.float32) * 0.1         # cnn2 1x1 weight
    b2 = jax.random.normal(kb2, (Cout,), jnp.float32) * 0.1              # cnn2 bias

    out = jax.block_until_ready(expert_forward(x, w1, gamma, beta, w2, b2))
    ref = jax.block_until_ready(expert_reference(x, w1, gamma, beta, w2, b2))

    assert out.shape == (N, Cout, H, W)
    # bf16 MXU inputs (with f32 accumulation) -> relaxed tolerance vs. the pure-f32 reference.
    max_err = float(jnp.max(jnp.abs(out - ref)))
    assert max_err < 5e-2, max_err

    print("KERNEL_OK")
</pallas_src>

<mosaic_0001>
module attributes {stable_mosaic.version = 11 : i64} {
  func.func @_stats_kernel(%arg0: i32, %arg1: memref<40x256xbf16, #tpu.memory_space<vmem>>, %arg2: memref<32x40xbf16, #tpu.memory_space<vmem>>, %arg3: memref<1x32x1xf32, #tpu.memory_space<vmem>>, %arg4: memref<1x32x1xf32, #tpu.memory_space<vmem>>) attributes {dimension_semantics = [#tpu.dimension_semantics<parallel>], iteration_bounds = array<i64: 2>, scalar_prefetch = 0 : i64, scratch_operands = 0 : i64, tpu.core_type = #tpu.core_type<tc>, window_params = [{transform_indices = @transform_0, window_bounds = array<i64: 40, 256>}, {pipeline_mode = #tpu.pipeline_mode<synchronous>, transform_indices = @transform_1, window_bounds = array<i64: 32, 40>}, {transform_indices = @transform_2, window_bounds = array<i64: 1, 32, 1>}, {transform_indices = @transform_3, window_bounds = array<i64: 1, 32, 1>}]} {
    %c0 = arith.constant 0 : index
    %c0_0 = arith.constant 0 : index
    %0 = vector.load %arg2[%c0, %c0_0] : memref<32x40xbf16, #tpu.memory_space<vmem>>, vector<32x40xbf16>
    %c0_1 = arith.constant 0 : index
    %c0_2 = arith.constant 0 : index
    %1 = vector.load %arg1[%c0_1, %c0_2] : memref<40x256xbf16, #tpu.memory_space<vmem>>, vector<40x256xbf16>
    %cst = arith.constant dense<0.000000e+00> : vector<32x256xf32>
    %2 = tpu.matmul %0, %1, %cst {dimension_numbers = #tpu.dot_dimension_numbers<[1], [0], [0], [1], [0, 0, 1, 1], [], []>} : vector<32x40xbf16>, vector<40x256xbf16>, vector<32x256xf32> -> vector<32x256xf32>
    %cst_3 = arith.constant dense<0.000000e+00> : vector<32xf32>
    %3 = vector.multi_reduction <add>, %2, %cst_3 [1] : vector<32x256xf32> to vector<32xf32>
    %4 = vector.shape_cast %3 : vector<32xf32> to vector<32x1xf32>
    %c0_4 = arith.constant 0 : index
    %c0_5 = arith.constant 0 : index
    %c0_6 = arith.constant 0 : index
    %5 = vector.load %arg3[%c0_4, %c0_5, %c0_6] : memref<1x32x1xf32, #tpu.memory_space<vmem>>, vector<1x32x1xf32>
    %6 = vector.shape_cast %5 : vector<1x32x1xf32> to vector<32x1xf32>
    %7 = vector.shape_cast %4 : vector<32x1xf32> to vector<1x32x1xf32>
    tpu.vector_store %arg3[%c0_4, %c0_5, %c0_6], %7 {strides = array<i32>} : memref<1x32x1xf32, #tpu.memory_space<vmem>>, vector<1x32x1xf32>,
    %8 = arith.mulf %2, %2 : vector<32x256xf32>
    %cst_7 = arith.constant dense<0.000000e+00> : vector<32xf32>
    %9 = vector.multi_reduction <add>, %8, %cst_7 [1] : vector<32x256xf32> to vector<32xf32>
    %10 = vector.shape_cast %9 : vector<32xf32> to vector<32x1xf32>
    %c0_8 = arith.constant 0 : index
    %c0_9 = arith.constant 0 : index
    %c0_10 = arith.constant 0 : index
    %11 = vector.load %arg4[%c0_8, %c0_9, %c0_10] : memref<1x32x1xf32, #tpu.memory_space<vmem>>, vector<1x32x1xf32>
    %12 = vector.shape_cast %11 : vector<1x32x1xf32> to vector<32x1xf32>
    %13 = vector.shape_cast %10 : vector<32x1xf32> to vector<1x32x1xf32>
    tpu.vector_store %arg4[%c0_8, %c0_9, %c0_10], %13 {strides = array<i32>} : memref<1x32x1xf32, #tpu.memory_space<vmem>>, vector<1x32x1xf32>,
    return
  }
  func.func @transform_0(%arg0: i32) -> (i32, i32) {
    %c0_i32 = arith.constant 0 : i32
    %c0_i32_0 = arith.constant 0 : i32
    return %c0_i32, %arg0 : i32, i32
  }
  func.func @transform_1(%arg0: i32) -> (i32, i32) {
    %c0_i32 = arith.constant 0 : i32
    %c0_i32_0 = arith.constant 0 : i32
    %c0_i32_1 = arith.constant 0 : i32
    return %c0_i32, %c0_i32_0 : i32, i32
  }
  func.func @transform_2(%arg0: i32) -> (i32, i32, i32) {
    %c0_i32 = arith.constant 0 : i32
    %c0_i32_0 = arith.constant 0 : i32
    %c0_i32_1 = arith.constant 0 : i32
    return %arg0, %c0_i32, %c0_i32_0 : i32, i32, i32
  }
  func.func @transform_3(%arg0: i32) -> (i32, i32, i32) {
    %c0_i32 = arith.constant 0 : i32
    %c0_i32_0 = arith.constant 0 : i32
    %c0_i32_1 = arith.constant 0 : i32
    return %arg0, %c0_i32, %c0_i32_0 : i32, i32, i32
  }
}

module attributes {stable_mosaic.version = 11 : i64} {
  func.func @_fused_kernel(%arg0: i32, %arg1: memref<40x256xbf16, #tpu.memory_space<vmem>>, %arg2: memref<32x40xbf16, #tpu.memory_space<vmem>>, %arg3: memref<32x1xf32, #tpu.memory_space<vmem>>, %arg4: memref<32x1xf32, #tpu.memory_space<vmem>>, %arg5: memref<8x32xbf16, #tpu.memory_space<vmem>>, %arg6: memref<8x1xf32, #tpu.memory_space<vmem>>, %arg7: memref<8x256xf32, #tpu.memory_space<vmem>>) attributes {dimension_semantics = [#tpu.dimension_semantics<parallel>], iteration_bounds = array<i64: 2>, scalar_prefetch = 0 : i64, scratch_operands = 0 : i64, tpu.core_type = #tpu.core_type<tc>, window_params = [{transform_indices = @transform_0, window_bounds = array<i64: 40, 256>}, {pipeline_mode = #tpu.pipeline_mode<synchronous>, transform_indices = @transform_1, window_bounds = array<i64: 32, 40>}, {pipeline_mode = #tpu.pipeline_mode<synchronous>, transform_indices = @transform_2, window_bounds = array<i64: 32, 1>}, {pipeline_mode = #tpu.pipeline_mode<synchronous>, transform_indices = @transform_3, window_bounds = array<i64: 32, 1>}, {pipeline_mode = #tpu.pipeline_mode<synchronous>, transform_indices = @transform_4, window_bounds = array<i64: 8, 32>}, {pipeline_mode = #tpu.pipeline_mode<synchronous>, transform_indices = @transform_5, window_bounds = array<i64: 8, 1>}, {transform_indices = @transform_6, window_bounds = array<i64: 8, 256>}]} {
    %c0 = arith.constant 0 : index
    %c0_0 = arith.constant 0 : index
    %0 = vector.load %arg2[%c0, %c0_0] : memref<32x40xbf16, #tpu.memory_space<vmem>>, vector<32x40xbf16>
    %c0_1 = arith.constant 0 : index
    %c0_2 = arith.constant 0 : index
    %1 = vector.load %arg1[%c0_1, %c0_2] : memref<40x256xbf16, #tpu.memory_space<vmem>>, vector<40x256xbf16>
    %cst = arith.constant dense<0.000000e+00> : vector<32x256xf32>
    %2 = tpu.matmul %0, %1, %cst {dimension_numbers = #tpu.dot_dimension_numbers<[1], [0], [0], [1], [0, 0, 1, 1], [], []>} : vector<32x40xbf16>, vector<40x256xbf16>, vector<32x256xf32> -> vector<32x256xf32>
    %c0_3 = arith.constant 0 : index
    %c0_4 = arith.constant 0 : index
    %3 = vector.load %arg3[%c0_3, %c0_4] : memref<32x1xf32, #tpu.memory_space<vmem>>, vector<32x1xf32>
    %4 = vector.broadcast %3 : vector<32x1xf32> to vector<32x256xf32>
    %5 = arith.mulf %2, %4 : vector<32x256xf32>
    %c0_5 = arith.constant 0 : index
    %c0_6 = arith.constant 0 : index
    %6 = vector.load %arg4[%c0_5, %c0_6] : memref<32x1xf32, #tpu.memory_space<vmem>>, vector<32x1xf32>
    %7 = vector.broadcast %6 : vector<32x1xf32> to vector<32x256xf32>
    %8 = arith.addf %5, %7 : vector<32x256xf32>
    %cst_7 = arith.constant 0.000000e+00 : f32
    %9 = vector.broadcast %cst_7 : f32 to vector<32x256xf32>
    %10 = arith.maximumf %8, %9 : vector<32x256xf32>
    %c0_8 = arith.constant 0 : index
    %c0_9 = arith.constant 0 : index
    %11 = vector.load %arg5[%c0_8, %c0_9] : memref<8x32xbf16, #tpu.memory_space<vmem>>, vector<8x32xbf16>
    %12 = arith.truncf %10 : vector<32x256xf32> to vector<32x256xbf16>
    %cst_10 = arith.constant dense<0.000000e+00> : vector<8x256xf32>
    %13 = tpu.matmul %11, %12, %cst_10 {dimension_numbers = #tpu.dot_dimension_numbers<[1], [0], [0], [1], [0, 0, 1, 1], [], []>} : vector<8x32xbf16>, vector<32x256xbf16>, vector<8x256xf32> -> vector<8x256xf32>
    %c0_11 = arith.constant 0 : index
    %c0_12 = arith.constant 0 : index
    %14 = vector.load %arg6[%c0_11, %c0_12] : memref<8x1xf32, #tpu.memory_space<vmem>>, vector<8x1xf32>
    %15 = vector.broadcast %14 : vector<8x1xf32> to vector<8x256xf32>
    %16 = arith.addf %13, %15 : vector<8x256xf32>
    %c0_13 = arith.constant 0 : index
    %c0_14 = arith.constant 0 : index
    %17 = vector.load %arg7[%c0_13, %c0_14] : memref<8x256xf32, #tpu.memory_space<vmem>>, vector<8x256xf32>
    tpu.vector_store %arg7[%c0_13, %c0_14], %16 {strides = array<i32>} : memref<8x256xf32, #tpu.memory_space<vmem>>, vector<8x256xf32>,
    return
  }
  func.func @transform_0(%arg0: i32) -> (i32, i32) {
    %c0_i32 = arith.constant 0 : i32
    %c0_i32_0 = arith.constant 0 : i32
    return %c0_i32, %arg0 : i32, i32
  }
  func.func @transform_1(%arg0: i32) -> (i32, i32) {
    %c0_i32 = arith.constant 0 : i32
    %c0_i32_0 = arith.constant 0 : i32
    %c0_i32_1 = arith.constant 0 : i32
    return %c0_i32, %c0_i32_0 : i32, i32
  }
  func.func @transform_2(%arg0: i32) -> (i32, i32) {
    %c0_i32 = arith.constant 0 : i32
    %c0_i32_0 = arith.constant 0 : i32
    %c0_i32_1 = arith.constant 0 : i32
    return %c0_i32, %c0_i32_0 : i32, i32
  }
  func.func @transform_3(%arg0: i32) -> (i32, i32) {
    %c0_i32 = arith.constant 0 : i32
    %c0_i32_0 = arith.constant 0 : i32
    %c0_i32_1 = arith.constant 0 : i32
    return %c0_i32, %c0_i32_0 : i32, i32
  }
  func.func @transform_4(%arg0: i32) -> (i32, i32) {
    %c0_i32 = arith.constant 0 : i32
    %c0_i32_0 = arith.constant 0 : i32
    %c0_i32_1 = arith.constant 0 : i32
    return %c0_i32, %c0_i32_0 : i32, i32
  }
  func.func @transform_5(%arg0: i32) -> (i32, i32) {
    %c0_i32 = arith.constant 0 : i32
    %c0_i32_0 = arith.constant 0 : i32
    %c0_i32_1 = arith.constant 0 : i32
    return %c0_i32, %c0_i32_0 : i32, i32
  }
  func.func @transform_6(%arg0: i32) -> (i32, i32) {
    %c0_i32 = arith.constant 0 : i32
    %c0_i32_0 = arith.constant 0 : i32
    return %c0_i32, %arg0 : i32, i32
  }
}

</mosaic_0001>

<bundles_post_ra>
// kernel: expert_forward.2
= control target key start
LH: loop header
LB: loop body
LE: loop exit
PB: predicated region body
PF: predicated region fallthrough
CT: control target
= control target key end

     0   :  { %s595_s12 = smov 0   ;;  %s597_s13 = smov 0   ;;  %s666_s0 = inlined_call_operand.vmem [shape: bf16[40,512], index: 0, kind: input, shape index: {}]   ;;  %s667_s1 = inlined_call_operand.vmem [shape: bf16[32,40], index: 1, kind: input, shape index: {}]   ;;  %s668_s2 = inlined_call_operand.vmem [shape: f32[2,32,1], index: 2, kind: output, shape index: {0}]   ;;  %s669_s3 = inlined_call_operand.vmem [shape: f32[2,32,1], index: 3, kind: output, shape index: {1}]  }
   0x1   :  { %s599_s14 = smov 0  }
   0x2 LB: > { %s469_s15 = sadd.s32 4294967295, %s573_s14   ;;  %s612_s16 = sadd.s32 1, %s573_s14   ;;  %s573_s14 = sphi %s599_s14, %s672_s14   ;;  %s569_s13 = sphi %s597_s13, %s671_s13   ;;  %s565_s12 = sphi %s595_s12, %s670_s12  }
   0x3   : > { %s18_s17 = ssub.s32 %s573_s14, %s612_s16  ;;  %s21_s18 = sadd.s32 1, %s569_s13 }
   0x4   : > { %p19_p0 = scmp.eq.s32.totalorder %s18_s17, 0  ;;  %p28_p1 = scmp.ne.s32.totalorder %s569_s13, %s565_s12 }
   0x5   : > { %p29_p2 = scmp.eq.s32.totalorder %s573_s14, 0  ;;  %p472_p4 = scmp.ge.s32.totalorder %s573_s14, 2 }
   0x6   : > { %s621_s19 = scalar_select %p19_p0, %s569_s13, %s21_s18  }
   0x7   : > { %p30_p3 = por %p29_p2, %p28_p1  ;;  %130 = sbr.rel (%p472_p4) target bundleno = 21 (0x15), region = 20 }
   0xc   : > { %133 = sbr.rel (!%p30_p3) target bundleno = 21 (0x15), region = 24  ;;  %s135_s20 = sand.u32 (%p30_p3), 1, %s569_s13  }
   0xd   : > { %s510_s21 = sshll.u32 (%p30_p3), %s573_s14, 3  ;;  %s525_s22 = smul.u32 (%p30_p3), 40, %s135_s20 }
   0xe   : > { %s140_s25 = scalar_lea.vmem (%p30_p3), %s666_s0, %s510_s21 }
   0xf   : > { %v177_v0 = vld [vmem:[%s140_s25] sm:$0xff] (%p30_p3)  ;;  %v179_v1 = vld [vmem:[%s140_s25 + $0x10] sm:$0xff] (%p30_p3)  ;;  %s137_s26 = scalar_lea.vmem (%p30_p3), [#allocation2], %s525_s22 }
  0x10   : > { %v181_v2 = vld [vmem:[%s140_s25 + $0x20] sm:$0xff] (%p30_p3)  ;;  %178 = vst [vmem:[%s137_s26] sm:$0xff] (%p30_p3), %v177_v0  ;;  %v183_v3 = vld [vmem:[%s140_s25 + $0x30] sm:$0xff] (%p30_p3) }
  0x11   : > { %180 = vst [vmem:[%s137_s26 + $0x8] sm:$0xff] %v179_v1  ;;  %v185_v4 = vld [vmem:[%s140_s25 + $0x40] sm:$0xff] }
  0x12   : > { %182 = vst [vmem:[%s137_s26 + $0x10] sm:$0xff] %v181_v2 }
  0x13   : > { %184 = vst [vmem:[%s137_s26 + $0x18] sm:$0xff] %v183_v3 }
  0x14   : > { %186 = vst [vmem:[%s137_s26 + $0x20] sm:$0xff] %v185_v4 }
  0x15 PF: > { %p475_p5 = scmp.ge.s32.totalorder %s573_s14, 1  ;;  %p191_p6 = scmp.lt.s32.totalorder %s573_s14, 3 }
  0x17   : > { %p192_p7 = pnand %p475_p5, %p191_p6 }
  0x18   : > { %s198_s27 = sand.u32 (!%p192_p7), 1, %s565_s12   ;;  %p227_p8 = scmp.lt.s32.totalorder (!%p192_p7), %s469_s15, 1 }
  0x19   : > { %195 = sbr.rel (%p192_p7) target bundleno = 315 (0x13b), region = 62 }
  0x1a   : > { %s526_s28 = smul.u32 (!%p192_p7), 40, %s198_s27 }
  0x1c   : > { %s200_s29 = scalar_lea.vmem (!%p192_p7), [#allocation2], %s526_s28 }
  0x1e   : > { %v246_v5 = vld [vmem:[%s200_s29 + $0x20] sm:$0xff]  ;;  %vm289_vm0 = vcmask 1043456   ;;  %v498_v10 = vld [vmem:[%s200_s29 + $0x10] sm:$0xf]  ;;  %v518_v11 = vld [vmem:[%s200_s29 + $0x14] sm:$0xf0] }
  0x1f   : > { %v270_v6 = vunpack.c.l.b16 %v246_v5  ;;  %v271_v7 = vunpack.c.h.b16 %v246_v5  ;;  %v517_v12 = vld [vmem:[%s200_s29 + $0x14] sm:$0xf]  ;;  %v500_v13 = vld [vmem:[%s200_s29 + $0x18] sm:$0xf0]  ;;  %v499_v16 = vor.u32 %v518_v11, %v498_v10  ;;  %v490_v18 = vld [vmem:[%s200_s29] sm:$0xf] }
  0x20   : > { %v503_v17 = vor.u32 %v517_v12, %v500_v13  ;;  %v516_v19 = vld [vmem:[%s200_s29 + $0x4] sm:$0xf0]  ;;  %v515_v20 = vld [vmem:[%s200_s29 + $0x4] sm:$0xf]  ;;  %v492_v21 = vld [vmem:[%s200_s29 + $0x8] sm:$0xf0] }
  0x21   : > { %v276_v8 = vpack.c.b16 %v270_v6, %v270_v6  ;;  %v277_v9 = vpack.c.b16 %v271_v7, %v271_v7  ;;  %v491_v22 = vor.u32 %v516_v19, %v490_v18  ;;  %v495_v23 = vor.u32 %v515_v20, %v492_v21  ;;  %v513_v24 = vld [vmem:[%s667_s1] sm:$0xff]  ;;  %v514_v25 = vld [vmem:[%s667_s1 + $0x8] sm:$0xff]  ;;  %s674_s15 = smov (!%p227_p8, %s469_s15), 1 }
  0x22   : > { %vm282_vm1 = vcmask 326656   ;;  %s511_s7 = sshll.u32 %s674_s15, 5  ;;  %vm346_vm2 = vcmask 7168  }
  0x23   : > { %v291_v14 = vsel %vm289_vm0, %v276_v8, 0  ;;  %v294_v15 = vsel %vm289_vm0, %v277_v9, 0  ;;  %s231_s10 = scalar_lea.vmem %s668_s2, %s511_s7  ;;  %s236_s17 = scalar_lea.vmem %s669_s3, %s511_s7 }
  0x24   : > { %301 = vmatpush.bf16.msra.mxu0 %v291_v14  ;;  %519 = vmatpush.bf16.msra.mxu2 %v291_v14 }
  0x25   : > { %320 = vmatpush.bf16.msra.mxu1 %v294_v15  ;;  %522 = vmatpush.bf16.msra.mxu3 %v294_v15 }
  0x28   : > { %302 = vmatpush.bf16.msra.mxu0 %v499_v16  ;;  %520 = vmatpush.bf16.msra.mxu2 %v499_v16 }
  0x29   : > { %321 = vmatpush.bf16.msra.mxu1 %v503_v17  ;;  %523 = vmatpush.bf16.msra.mxu3 %v503_v17 }
  0x2c   : > { %303 = vmatpush.bf16.msra.mxu0 %v491_v22  ;;  %521 = vmatpush.bf16.msra.mxu2 %v491_v22 }
  0x2d   : > { %322 = vmatpush.bf16.msra.mxu1 %v495_v23  ;;  %524 = vmatpush.bf16.msra.mxu3 %v495_v23 }
  0x2f   : > { %504 = vmatmul.msk.bf16.vlgmr.msra.gmra.mxu0 %vm282_vm1, %v513_v24  ;;  %505 = vmatmul.msk.bf16.vlgmr.msra.gmra.mxu2 %vm282_vm1, %v514_v25 }
  0x30   : > { %506 = vmatmul.msk.bf16.vlgmr.msra.gmra.mxu1 %vm282_vm1, %v513_v24  ;;  %507 = vmatmul.msk.bf16.vlgmr.msra.gmra.mxu3 %vm282_vm1, %v514_v25 }
  0xac   : > { %v305_v26 = vpop.f32.mrf.mxu0 }
  0xad   : > { %v351_v27 = vmul.f32 %v305_v26, %v305_v26  ;;  %v324_v28 = vpop.f32.mrf.mxu1 }
  0xae   : > { %v352_v29 = vmul.f32 %v324_v28, %v324_v28  ;;  %v334_v30 = vadd.f32 %v324_v28, %v305_v26 }
  0xb0   : > { %335 = vadd.xlane.f32.xlu0 %v334_v30  ;;  %v359_v31 = vadd.f32 %v352_v29, %v351_v27 }
  0xb2   : > { %360 = vadd.xlane.f32.xlu2 %v359_v31  ;;  %v310_v32 = vpop.f32.mrf.mxu2 }
  0xb3   : > { %v329_v33 = vpop.f32.mrf.mxu3  ;;  %v355_v41 = vmul.f32 %v310_v32, %v310_v32 }
  0xb4   : > { %v307_v34 = vpop.f32.mrf.mxu0  ;;  %v340_v35 = vadd.f32 %v329_v33, %v310_v32  ;;  %v356_v42 = vmul.f32 %v329_v33, %v329_v33 }
  0xb5   : > { %v353_v36 = vmul.f32 %v307_v34, %v307_v34  ;;  %v326_v37 = vpop.f32.mrf.mxu1 }
  0xb6   : > { %v337_v38 = vadd.f32 %v326_v37, %v307_v34  ;;  %v354_v39 = vmul.f32 %v326_v37, %v326_v37  ;;  %341 = vadd.xlane.f32.xlu1 %v340_v35  ;;  %v365_v46 = vadd.f32 %v356_v42, %v355_v41 }
  0xb8   : > { %338 = vadd.xlane.f32.xlu0 %v337_v38  ;;  %v362_v40 = vadd.f32 %v354_v39, %v353_v36 }
  0xba   : > { %363 = vadd.xlane.f32.xlu2 %v362_v40  ;;  %v312_v43 = vpop.f32.mrf.mxu2 }
  0xbb   : > { %v331_v44 = vpop.f32.mrf.mxu3  ;;  %v357_v47 = vmul.f32 %v312_v43, %v312_v43 }
  0xbc   : > { %v343_v45 = vadd.f32 %v331_v44, %v312_v43  ;;  %v358_v48 = vmul.f32 %v331_v44, %v331_v44 }
  0xbe   : > { %344 = vadd.xlane.f32.xlu1 %v343_v45  ;;  %v368_v49 = vadd.f32 %v358_v48, %v357_v47 }
  0xc0   : > { %366 = vadd.xlane.f32.xlu0 %v365_v46 }
  0xc6   : > { %369 = vadd.xlane.f32.xlu1 %v368_v49 }
 0x123   : > { %v336_v50 = vpop.xlane.xlu0 %335 }
 0x124   : > { %347 = vst.msk [vmem:[%s231_s10] sm:$0xff] %vm346_vm2, %v336_v50 }
 0x125   : > { %v361_v51 = vpop.xlane.xlu2 %360 }
 0x126   : > { %371 = vst.msk [vmem:[%s236_s17] sm:$0xff] %vm346_vm2, %v361_v51 }
 0x129   : > { %v342_v52 = vpop.xlane.xlu1 %341 }
 0x12a   : > { %349 = vst.msk [vmem:[%s231_s10 + $0x10] sm:$0xff] %vm346_vm2, %v342_v52 }
 0x12b   : > { %v339_v53 = vpop.xlane.xlu0 %338 }
 0x12c   : > { %348 = vst.msk [vmem:[%s231_s10 + $0x8] sm:$0xff] %vm346_vm2, %v339_v53 }
 0x12d   : > { %v364_v54 = vpop.xlane.xlu2 %363 }
 0x12e   : > { %372 = vst.msk [vmem:[%s236_s17 + $0x8] sm:$0xff] %vm346_vm2, %v364_v54 }
 0x131   : > { %v345_v55 = vpop.xlane.xlu1 %344 }
 0x132   : > { %350 = vst.msk [vmem:[%s231_s10 + $0x18] sm:$0xff] %vm346_vm2, %v345_v55 }
 0x133   : > { %v367_v56 = vpop.xlane.xlu0 %366 }
 0x134   : > { %373 = vst.msk [vmem:[%s236_s17 + $0x10] sm:$0xff] %vm346_vm2, %v367_v56 }
 0x139   : > { %v370_v57 = vpop.xlane.xlu1 %369 }
 0x13a   : > { %374 = vst.msk [vmem:[%s236_s17 + $0x18] sm:$0xff] %vm346_vm2, %v370_v57 }
 0x13b PF: > { %p11_p9 = scmp.ge.s32.totalorder %s612_s16, 4   ;;  %s670_s12 = smov %s569_s13 }
 0x13c   : > { %s671_s13 = smov %s621_s19  ;;  %s672_s14 = smov %s612_s16 }
 0x13d   :  { %13 = sbr.rel (!%p11_p9) target bundleno = 2 (0x2), region = 113 }

// kernel: expert_forward.3
= control target key start
LH: loop header
LB: loop body
LE: loop exit
PB: predicated region body
PF: predicated region fallthrough
CT: control target
= control target key end

     0   :  { %s718_s21 = smov 0   ;;  %s720_s22 = smov 0   ;;  %s806_s0 = inlined_call_operand.vmem [shape: bf16[40,512], index: 0, kind: input, shape index: {}]   ;;  %s807_s1 = inlined_call_operand.vmem [shape: bf16[32,40], index: 1, kind: input, shape index: {}]   ;;  %s808_s2 = inlined_call_operand.vmem [shape: f32[32,1], index: 2, kind: input, shape index: {}]   ;;  %s809_s3 = inlined_call_operand.vmem [shape: f32[32,1], index: 3, kind: input, shape index: {}]   ;;  %s810_s4 = inlined_call_operand.vmem [shape: bf16[8,32], index: 4, kind: input, shape index: {}]   ;;  %s811_s5 = inlined_call_operand.vmem [shape: f32[8,1], index: 5, kind: input, shape index: {}]   ;;  %s812_s6 = inlined_call_operand.vmem [shape: f32[8,512], index: 6, kind: output, shape index: {}]  }
   0x1   :  { %s722_s23 = smov 0  }
   0x2 LB: > { %s580_s24 = sadd.s32 4294967295, %s680_s23   ;;  %s735_s25 = sadd.s32 1, %s680_s23   ;;  %s680_s23 = sphi %s722_s23, %s815_s23   ;;  %s676_s22 = sphi %s720_s22, %s814_s22   ;;  %s672_s21 = sphi %s718_s21, %s813_s21  }
   0x3   : > { %s20_s26 = ssub.s32 %s680_s23, %s735_s25  ;;  %s23_s27 = sadd.s32 1, %s676_s22 }
   0x4   : > { %p21_p0 = scmp.eq.s32.totalorder %s20_s26, 0  ;;  %p30_p1 = scmp.ne.s32.totalorder %s676_s22, %s672_s21 }
   0x5   : > { %p31_p2 = scmp.eq.s32.totalorder %s680_s23, 0  ;;  %p583_p4 = scmp.ge.s32.totalorder %s680_s23, 2 }
   0x6   : > { %s744_s28 = scalar_select %p21_p0, %s676_s22, %s23_s27  }
   0x7   : > { %p32_p3 = por %p31_p2, %p30_p1  ;;  %202 = sbr.rel (%p583_p4) target bundleno = 21 (0x15), region = 36 }
   0xc   : > { %205 = sbr.rel (!%p32_p3) target bundleno = 21 (0x15), region = 40  ;;  %s207_s29 = sand.u32 (%p32_p3), 1, %s676_s22  }
   0xd   : > { %s621_s30 = sshll.u32 (%p32_p3), %s680_s23, 3  ;;  %s628_s7 = smul.u32 (%p32_p3), 40, %s207_s29 }
   0xe   : > { %s212_s10 = scalar_lea.vmem (%p32_p3), %s806_s0, %s621_s30 }
   0xf   : > { %v249_v0 = vld [vmem:[%s212_s10] sm:$0xff] (%p32_p3)  ;;  %v251_v1 = vld [vmem:[%s212_s10 + $0x10] sm:$0xff] (%p32_p3)  ;;  %s209_s11 = scalar_lea.vmem (%p32_p3), [#allocation2], %s628_s7 }
  0x10   : > { %v253_v2 = vld [vmem:[%s212_s10 + $0x20] sm:$0xff] (%p32_p3)  ;;  %250 = vst [vmem:[%s209_s11] sm:$0xff] (%p32_p3), %v249_v0  ;;  %v255_v3 = vld [vmem:[%s212_s10 + $0x30] sm:$0xff] (%p32_p3) }
  0x11   : > { %252 = vst [vmem:[%s209_s11 + $0x8] sm:$0xff] %v251_v1  ;;  %v257_v4 = vld [vmem:[%s212_s10 + $0x40] sm:$0xff] }
  0x12   : > { %254 = vst [vmem:[%s209_s11 + $0x10] sm:$0xff] %v253_v2 }
  0x13   : > { %256 = vst [vmem:[%s209_s11 + $0x18] sm:$0xff] %v255_v3 }
  0x14   : > { %258 = vst [vmem:[%s209_s11 + $0x20] sm:$0xff] %v257_v4 }
  0x15 PF: > { %p586_p5 = scmp.ge.s32.totalorder %s680_s23, 1  ;;  %p263_p6 = scmp.lt.s32.totalorder %s680_s23, 3 }
  0x17   : > { %p264_p7 = pnand %p586_p5, %p263_p6 }
  0x18   : > { %s270_s12 = sand.u32 (!%p264_p7), 1, %s672_s21   ;;  %s587_s20 = sshll.u32 (!%p264_p7), %s580_s24, 1 }
  0x19   : > { %267 = sbr.rel (%p264_p7) target bundleno = 354 (0x162), region = 78  ;;  %p301_p8 = scmp.lt.s32.totalorder (!%p264_p7), %s587_s20, 3 }
  0x1a   : > { %s629_s15 = smul.u32 (!%p264_p7), 40, %s270_s12 }
  0x1c   : > { %s272_s18 = scalar_lea.vmem (!%p264_p7), [#allocation2], %s629_s15 }
  0x1e   : > { %v405_v5 = vld [vmem:[%s808_s2 + $0x10] sm:$0xff]  ;;  %v682_v6 = vmov 0   ;;  %v315_v8 = vld [vmem:[%s272_s18 + $0x20] sm:$0xff]  ;;  %vm358_vm0 = vcmask 1043456   ;;  %v627_v12 = vld [vmem:[%s272_s18 + $0x14] sm:$0xf0] }
  0x1f   : > { %655 = vset.pattern.permute.xlu0 %v682_v6  ;;  %656 = vset.pattern.permute.xlu1 %v682_v6  ;;  %v437_v7 = vld [vmem:[%s809_s3 + $0x10] sm:$0xff]  ;;  %v339_v9 = vunpack.c.l.b16 %v315_v8  ;;  %v340_v10 = vunpack.c.h.b16 %v315_v8  ;;  %v609_v16 = vld [vmem:[%s272_s18 + $0x18] sm:$0xf0]  ;;  %v599_v24 = vld [vmem:[%s272_s18] sm:$0xf]  ;;  %vm351_vm1 = vcmask 326656  }
  0x20   : > { %419 = vperm.xlu0 %655, %v405_v5   ;;  %451 = vperm.xlu1 %656, %v437_v7   ;;  %v607_v11 = vld [vmem:[%s272_s18 + $0x10] sm:$0xf]  ;;  %v626_v15 = vld [vmem:[%s272_s18 + $0x14] sm:$0xf]  ;;  %v403_v17 = vld [vmem:[%s808_s2] sm:$0xff]  ;;  %vm486_vm2 = vcmask 261120  }
  0x21   : > { %657 = vset.pattern.permute.xlu2 %v682_v6  ;;  %v345_v13 = vpack.c.b16 %v339_v9, %v339_v9  ;;  %v346_v14 = vpack.c.b16 %v340_v10, %v340_v10  ;;  %v406_v18 = vld [vmem:[%s808_s2 + $0x18] sm:$0xff]  ;;  %v608_v22 = vor.u32 %v627_v12, %v607_v11  ;;  %v612_v23 = vor.u32 %v626_v15, %v609_v16  ;;  %v625_v25 = vld [vmem:[%s272_s18 + $0x4] sm:$0xf0]  ;;  %v624_v26 = vld [vmem:[%s272_s18 + $0x4] sm:$0xf]  ;;  %s817_s20 = smov (!%p301_p8, %s587_s20), 3 }
  0x22   : > { %v438_v19 = vld [vmem:[%s809_s3 + $0x18] sm:$0xff]  ;;  %409 = vperm.xlu2 %657, %v403_v17   ;;  %v601_v27 = vld [vmem:[%s272_s18 + $0x8] sm:$0xf0]  ;;  %v600_v29 = vor.u32 %v625_v25, %v599_v24  ;;  %v435_v31 = vld [vmem:[%s809_s3] sm:$0xff]  ;;  %s588_s21 = sshll.u32 %s817_s20, 3 }
  0x23   : > { %v360_v20 = vsel %vm358_vm0, %v345_v13, 0  ;;  %v363_v21 = vsel %vm358_vm0, %v346_v14, 0  ;;  %v404_v28 = vld [vmem:[%s808_s2 + $0x8] sm:$0xff]  ;;  %v604_v30 = vor.u32 %v624_v26, %v601_v27  ;;  %v622_v33 = vld [vmem:[%s807_s1] sm:$0xff]  ;;  %s304_s29 = scalar_lea.vmem %s812_s6, %s588_s21 }
  0x24   : > { %370 = vmatpush.bf16.msra.mxu0 %v360_v20  ;;  %389 = vmatpush.bf16.msra.mxu1 %v363_v21  ;;  %v436_v32 = vld [vmem:[%s809_s3 + $0x8] sm:$0xff]  ;;  %v480_v34 = vld [vmem:[%s811_s5] sm:$0xff] }
  0x25   : > { %v623_v35 = vld [vmem:[%s807_s1 + $0x8] sm:$0xff]  ;;  %v475_v16 = vld [vmem:[%s810_s4] sm:$0xf] }
  0x28   : > { %424 = vperm.xlu0 %655, %v406_v18   ;;  %456 = vperm.xlu1 %656, %v438_v19  }
  0x29   : > { %371 = vmatpush.bf16.msra.mxu0 %v608_v22  ;;  %390 = vmatpush.bf16.msra.mxu1 %v612_v23 }
  0x2a   : > { %414 = vperm.xlu2 %657, %v404_v28  }
  0x2d   : > { %372 = vmatpush.bf16.msra.mxu0 %v600_v29  ;;  %391 = vmatpush.bf16.msra.mxu1 %v604_v30 }
  0x30   : > { %441 = vperm.xlu0 %655, %v435_v31   ;;  %446 = vperm.xlu1 %656, %v436_v32  }
  0x31   : > { %613 = vmatmul.msk.bf16.vlgmr.msra.gmra.mxu0 %vm351_vm1, %v622_v33  ;;  %615 = vmatmul.msk.bf16.vlgmr.msra.gmra.mxu1 %vm351_vm1, %v622_v33 }
  0x32   : > { %483 = vperm.xlu2 %657, %v480_v34  }
  0x41   : > { %614 = vmatmul.msk.bf16.gmra.mxu0 %vm351_vm1, %v623_v35  ;;  %616 = vmatmul.msk.bf16.gmra.mxu1 %vm351_vm1, %v623_v35 }
  0x7c   : > { %v410_v42 = vpop.permute.xlu2 %409 }
  0x84   : > { %v415_v47 = vpop.permute.xlu2 %414 }
  0x8c   : > { %v484_v17 = vpop.permute.xlu2 %483 }
  0x92   : > { %v452_v38 = vpop.permute.xlu1 %451  ;;  %v420_v39 = vpop.permute.xlu0 %419 }
  0x9a   : > { %v457_v43 = vpop.permute.xlu1 %456  ;;  %v425_v44 = vpop.permute.xlu0 %424 }
  0xa2   : > { %v447_v52 = vpop.permute.xlu1 %446  ;;  %v442_v57 = vpop.permute.xlu0 %441 }
  0xae   : > { %v374_v36 = vpop.f32.mrf.mxu0  ;;  %v393_v37 = vpop.f32.mrf.mxu1 }
  0xaf   : > { %v427_v53 = vmul.f32 %v410_v42, %v374_v36  ;;  %v428_v54 = vmul.f32 %v410_v42, %v393_v37 }
  0xb1   : > { %v459_v2 = vadd.f32 %v442_v57, %v427_v53  ;;  %v460_v3 = vadd.f32 %v442_v57, %v428_v54 }
  0xb3   : > { %v467_v12 = vmax.f32 %v459_v2, 0.0  ;;  %v468_v13 = vmax.f32 %v460_v3, 0.0 }
  0xb6   : > { %v376_v40 = vpop.f32.mrf.mxu0  ;;  %v395_v41 = vpop.f32.mrf.mxu1 }
  0xb7   : > { %v429_v50 = vmul.f32 %v415_v47, %v376_v40  ;;  %v430_v51 = vmul.f32 %v415_v47, %v395_v41 }
  0xb9   : > { %v461_v62 = vadd.f32 %v447_v52, %v429_v50  ;;  %v462_v63 = vadd.f32 %v447_v52, %v430_v51 }
  0xbb   : > { %v469_v8 = vmax.f32 %v461_v62, 0.0  ;;  %v470_v9 = vmax.f32 %v462_v63, 0.0 }
  0xbd   : > { %v476_v14 = vpack.c.bf16 %v469_v8, %v467_v12  ;;  %v477_v15 = vpack.c.bf16 %v470_v9, %v468_v13 }
  0xbe   : > { %v379_v45 = vpop.f32.mrf.mxu0  ;;  %v398_v46 = vpop.f32.mrf.mxu1 }
  0xbf   : > { %v431_v48 = vmul.f32 %v420_v39, %v379_v45  ;;  %v432_v49 = vmul.f32 %v420_v39, %v398_v46 }
  0xc1   : > { %v463_v60 = vadd.f32 %v452_v38, %v431_v48  ;;  %v464_v61 = vadd.f32 %v452_v38, %v432_v49 }
  0xc3   : > { %v471_v4 = vmax.f32 %v463_v60, 0.0  ;;  %v472_v6 = vmax.f32 %v464_v61, 0.0 }
  0xc6   : > { %v381_v55 = vpop.f32.mrf.mxu0  ;;  %v400_v56 = vpop.f32.mrf.mxu1 }
  0xc7   : > { %v433_v58 = vmul.f32 %v425_v44, %v381_v55  ;;  %v434_v59 = vmul.f32 %v425_v44, %v400_v56 }
  0xc9   : > { %v465_v0 = vadd.f32 %v457_v43, %v433_v58  ;;  %v466_v1 = vadd.f32 %v457_v43, %v434_v59 }
  0xcb   : > { %v473_v5 = vmax.f32 %v465_v0, 0.0  ;;  %v474_v7 = vmax.f32 %v466_v1, 0.0 }
  0xcd   : > { %v478_v10 = vpack.c.bf16 %v473_v5, %v471_v4  ;;  %v479_v11 = vpack.c.bf16 %v474_v7, %v472_v6 }
  0xcf   : > { %496 = vmatpush.bf16.msra.mxu2 %v478_v10  ;;  %509 = vmatpush.bf16.msra.mxu3 %v479_v11 }
  0xd3   : > { %497 = vmatpush.bf16.msra.mxu2 %v476_v14  ;;  %510 = vmatpush.bf16.msra.mxu3 %v477_v15 }
  0xd6   : > { %617 = vmatmul.msk.bf16.vlgmr.msra.gmra.mxu2 %vm486_vm2, %v475_v16  ;;  %618 = vmatmul.msk.bf16.vlgmr.msra.gmra.mxu3 %vm486_vm2, %v475_v16 }
 0x159   : > { %v499_v18 = vpop.f32.mrf.mxu2  ;;  %v512_v19 = vpop.f32.mrf.mxu3 }
 0x15a   : > { %v500_v20 = vadd.f32 %v499_v18, %v484_v17  ;;  %v513_v21 = vadd.f32 %v512_v19, %v484_v17 }
 0x15c   : > { %516 = vst [vmem:[%s304_s29] sm:$0xff] %v500_v20 }
 0x15d   : > { %517 = vst [vmem:[%s304_s29 + $0x8] sm:$0xff] %v513_v21 }
 0x161   : > { %v501_v22 = vpop.f32.mrf.mxu2  ;;  %v514_v23 = vpop.f32.mrf.mxu3 }
 0x162 PF: > { %p13_p9 = scmp.ge.s32.totalorder %s735_s25, 4   ;;  %s813_s21 = smov %s676_s22 }
 0x163   : > { %s814_s22 = smov %s744_s28  ;;  %s815_s23 = smov %s735_s25 }
 0x164   :  { %15 = sbr.rel (!%p13_p9) target bundleno = 2 (0x2), region = 117 }

</bundles_post_ra>
